<compile_context>
chip_gen: v7x
topology: tpu7x:2x2x1
jax: 0.10.0
libtpu: 0.0.40
codegen_flags: <defaults>
</compile_context>

<pallas_src>
import math
from functools import partial

import jax
import jax.numpy as jnp
from jax.experimental import pallas as pl
from jax.experimental.pallas import tpu as pltpu

LOG_STD_MIN = -20.0
LOG_STD_MAX = 2.0
LANES = 128


def _round_up(n, m):
    return (n + m - 1) // m * m


# ----------------------------------------------------------------------------
# Kernel
# ----------------------------------------------------------------------------
def gaussian_dist_kernel(x_ref, slab_ref, eps_ref, out_ref, *, F_in, A, rows):
    """Fused MLP trunk + Gaussian head.

    slab_ref row layout (all blocks full 128 lanes, zero-padded):
      [r_w1 : r_w1+F_in)  W1   (cols [0,H1) valid)
      [r_b1]              b1
      [r_w2 : r_w2+128)   W2   (rows [0,H1), cols [0,H2) valid)
      [r_b2]              b2
      [r_wh : r_wh+128)   Wh packed as [w_mu | w_ls | w_ls | w_mu | w_ls | 0..]
      [r_bh]              bh packed the same way

    out_ref lanes: [mu | log_std | std | action | 0 ...] in blocks of A.
    """
    r_w1, r_b1, r_w2, r_b2, r_wh, r_bh = rows
    cd = slab_ref.dtype  # matmul operand dtype (f32 default, bf16 optional)

    # --- MLP trunk: two ReLU layers, all operands lane-dense. ---
    x = x_ref[...].astype(cd)
    w1 = slab_ref[r_w1:r_w1 + F_in, :]
    b1 = slab_ref[r_b1:r_b1 + 1, :]
    h = jnp.dot(x, w1, preferred_element_type=jnp.float32)
    h = jnp.maximum(h + b1, 0.0)

    w2 = slab_ref[r_w2:r_w2 + LANES, :]
    b2 = slab_ref[r_b2:r_b2 + 1, :]
    h = jnp.dot(h.astype(cd), w2, preferred_element_type=jnp.float32)
    h = jnp.maximum(h + b2, 0.0)

    # --- Fused (duplicated) head: ONE matmul + ONE tanh. ---
    # head lanes: [t_mu | t_ls | t_ls | t_mu | t_ls | 0 ...] (blocks of A)
    wh = slab_ref[r_wh:r_wh + LANES, :]
    bh = slab_ref[r_bh:r_bh + 1, :]
    head = jnp.dot(h.astype(cd), wh, preferred_element_type=jnp.float32)
    head = jnp.tanh(head + bh)                                   # EUP

    lane = jax.lax.broadcasted_iota(jnp.int32, head.shape, 1)
    affine_zone = ((lane >= A) & (lane < 3 * A)) | ((lane >= 4 * A) & (lane < 5 * A))

    # P lanes: [mu | log_std | log_std | mu | log_std | 0 ...]
    P = jnp.where(
        affine_zone,
        LOG_STD_MIN + 0.5 * (LOG_STD_MAX - LOG_STD_MIN) * (head + 1.0),
        head,
    )
    # E lanes: [.  | std     | std     | .  | std     | . ...]  (one EUP exp)
    E = jnp.exp(P)

    # std is duplicated on both sides of the action block [3A,4A), so a
    # one-block rotate lands std there regardless of rotate direction (XLU).
    E_shift = pltpu.roll(E, A, 1)

    # action = mu + std * eps  (valid on lanes [3A,4A); eps is positioned there)
    action = P + E_shift * eps_ref[...]

    out_ref[...] = jnp.where(
        lane < 2 * A, P,
        jnp.where(lane < 3 * A, E,
                  jnp.where(lane < 4 * A, action, 0.0)),
    )


# ----------------------------------------------------------------------------
# One-time parameter packing (hoisted out of the forward path)
# ----------------------------------------------------------------------------
def pack_params(params, output_size, dtype=jnp.float32):
    """Pack all weights/biases into one lane-dense [rows, 128] slab."""
    F_in, H1 = params["w1"].shape
    H2 = params["w2"].shape[1]
    A = output_size
    assert H1 <= LANES and H2 <= LANES and 5 * A <= LANES

    r_w1 = 0
    r_b1 = _round_up(F_in, 8)
    r_w2 = r_b1 + 8
    r_b2 = r_w2 + LANES
    r_wh = r_b2 + 8
    r_bh = r_wh + LANES
    n_rows = r_bh + 8  # keep every block start 8-row aligned

    slab = jnp.zeros((n_rows, LANES), jnp.float32)
    slab = slab.at[r_w1:r_w1 + F_in, :H1].set(params["w1"])
    slab = slab.at[r_b1, :H1].set(params["b1"].reshape(-1))
    slab = slab.at[r_w2:r_w2 + H1, :H2].set(params["w2"])
    slab = slab.at[r_b2, :H2].set(params["b2"].reshape(-1))

    # Duplicated head packing: [w_mu | w_ls | w_ls | w_mu | w_ls | 0 ...]
    wh = jnp.zeros((H2, LANES), jnp.float32)
    bh = jnp.zeros((LANES,), jnp.float32)
    w_mu, w_ls = params["w_mu"], params["w_ls"]
    b_mu, b_ls = params["b_mu"].reshape(-1), params["b_ls"].reshape(-1)
    for blk, (w, b) in enumerate(
        [(w_mu, b_mu), (w_ls, b_ls), (w_ls, b_ls), (w_mu, b_mu), (w_ls, b_ls)]
    ):
        wh = wh.at[:, blk * A:(blk + 1) * A].set(w)
        bh = bh.at[blk * A:(blk + 1) * A].set(b)
    slab = slab.at[r_wh:r_wh + H2, :].set(wh)
    slab = slab.at[r_bh, :].set(bh)

    meta = dict(F_in=F_in, H1=H1, H2=H2, A=A,
                rows=(r_w1, r_b1, r_w2, r_b2, r_wh, r_bh))
    return slab.astype(dtype), meta


# ----------------------------------------------------------------------------
# Forward wrapper
# ----------------------------------------------------------------------------
def gaussian_dist_forward(x, slab, eps, meta, *, batch_block=None):
    """x: [B, F_in] f32; slab: packed params; eps: [B, 128] N(0,1) noise
    (only lanes [3A,4A) are used for the sample).
    Returns (mu, log_std, std, action), each [B, A]."""
    B = x.shape[0]
    A, F_in = meta["A"], meta["F_in"]
    rows = meta["rows"]
    n_rows = slab.shape[0]

    kern = partial(gaussian_dist_kernel, F_in=F_in, A=A, rows=rows)

    flops = 2 * B * (F_in * LANES + LANES * LANES + LANES * LANES)
    transcendentals = 2 * B * LANES  # tanh + exp over full vregs
    bytes_accessed = (
        int(x.size) * x.dtype.itemsize
        + int(slab.size) * slab.dtype.itemsize
        + int(eps.size) * eps.dtype.itemsize
        + B * LANES * 4
    )
    cost = pl.CostEstimate(flops=flops, transcendentals=transcendentals,
                           bytes_accessed=bytes_accessed)

    if batch_block is None:
        # Latency path: no grid (a grid is pure overhead at small B).
        vmem = pl.BlockSpec(memory_space=pltpu.MemorySpace.VMEM)
        out = pl.pallas_call(
            kern,
            out_shape=jax.ShapeDtypeStruct((B, LANES), jnp.float32),
            in_specs=[vmem, vmem, vmem],
            out_specs=vmem,
            compiler_params=pltpu.CompilerParams(vmem_limit_bytes=4 * 1024 * 1024),
            cost_estimate=cost,
        )(x, slab, eps)
    else:
        # Throughput path (e.g. v7x, large B): parallel batch grid; the weight
        # slab uses a constant index_map so it stays VMEM-resident.
        bt = batch_block
        assert B % bt == 0 and bt % 8 == 0
        out = pl.pallas_call(
            kern,
            out_shape=jax.ShapeDtypeStruct((B, LANES), jnp.float32),
            grid=(B // bt,),
            in_specs=[
                pl.BlockSpec((bt, F_in), lambda i: (i, 0)),
                pl.BlockSpec((n_rows, LANES), lambda i: (0, 0)),
                pl.BlockSpec((bt, LANES), lambda i: (i, 0)),
            ],
            out_specs=pl.BlockSpec((bt, LANES), lambda i: (i, 0)),
            compiler_params=pltpu.CompilerParams(
                vmem_limit_bytes=4 * 1024 * 1024,
                dimension_semantics=("parallel",),
            ),
            cost_estimate=cost,
        )(x, slab, eps)

    mu = out[:, :A]
    log_std = out[:, A:2 * A]
    std = out[:, 2 * A:3 * A]
    action = out[:, 3 * A:4 * A]
    return mu, log_std, std, action


# ----------------------------------------------------------------------------
# Init + pure-JAX reference
# ----------------------------------------------------------------------------
def init_params(key, input_size, hidden_sizes, output_size):
    """Parameter init mimicking the PyTorch module's shapes.
    Hidden layers: kaiming-uniform-ish; mu/log_std heads: xavier + zero bias.
    Weights stored [in, out]; biases as [1, out]."""
    assert len(hidden_sizes) == 2
    k1, k2, k3, k4, k5, k6 = jax.random.split(key, 6)

    def kaiming_uniform(k, fan_in, fan_out):
        bound = 1.0 / math.sqrt(fan_in)
        return jax.random.uniform(k, (fan_in, fan_out), jnp.float32, -bound, bound)

    def xavier_uniform(k, fan_in, fan_out):
        bound = math.sqrt(6.0 / (fan_in + fan_out))
        return jax.random.uniform(k, (fan_in, fan_out), jnp.float32, -bound, bound)

    h1, h2 = hidden_sizes
    return {
        "w1": kaiming_uniform(k1, input_size, h1),
        "b1": jax.random.uniform(k2, (1, h1), jnp.float32,
                                 -1.0 / math.sqrt(input_size),
                                 1.0 / math.sqrt(input_size)),
        "w2": kaiming_uniform(k3, h1, h2),
        "b2": jax.random.uniform(k4, (1, h2), jnp.float32,
                                 -1.0 / math.sqrt(h1), 1.0 / math.sqrt(h1)),
        "w_mu": xavier_uniform(k5, h2, output_size),
        "b_mu": jnp.zeros((1, output_size), jnp.float32),
        "w_ls": xavier_uniform(k6, h2, output_size),
        "b_ls": jnp.zeros((1, output_size), jnp.float32),
    }


def reference_forward(x, params, eps):
    h = jnp.maximum(x @ params["w1"] + params["b1"], 0.0)
    h = jnp.maximum(h @ params["w2"] + params["b2"], 0.0)
    mu = jnp.tanh(h @ params["w_mu"] + params["b_mu"])
    ls = jnp.tanh(h @ params["w_ls"] + params["b_ls"])
    ls = LOG_STD_MIN + 0.5 * (LOG_STD_MAX - LOG_STD_MIN) * (ls + 1.0)
    std = jnp.exp(ls)
    action = mu + std * eps
    return mu, ls, std, action


if __name__ == "__main__":
    key = jax.random.PRNGKey(0)
    k_param, k_x, k_eps = jax.random.split(key, 3)

    batch = 8
    input_size = 32
    hidden_sizes = [32, 32]
    output_size = 4
    A = output_size

    params = init_params(k_param, input_size, hidden_sizes, output_size)
    # One-time packing (hoisted out of the forward path).
    slab, meta = pack_params(params, output_size, dtype=jnp.float32)

    x = jax.random.normal(k_x, (batch, input_size), jnp.float32)
    # Lane-dense noise; only lanes [3A, 4A) feed the reparameterized sample.
    eps = jax.random.normal(k_eps, (batch, LANES), jnp.float32)

    # Latency path (no grid).
    mu, log_std, std, action = gaussian_dist_forward(x, slab, eps, meta)
    jax.block_until_ready((mu, log_std, std, action))

    # Gridded / parallel-batch path (what v7x would use at production B).
    mu_g, ls_g, std_g, act_g = gaussian_dist_forward(
        x, slab, eps, meta, batch_block=8)
    jax.block_until_ready((mu_g, ls_g, std_g, act_g))

    # Correctness vs pure-JAX reference.
    eps_used = eps[:, 3 * A:4 * A]
    mu_r, ls_r, std_r, act_r = reference_forward(x, params, eps_used)

    assert jnp.allclose(mu, mu_r, atol=1e-5), "mu mismatch"
    assert jnp.allclose(log_std, ls_r, atol=1e-4), "log_std mismatch"
    assert jnp.allclose(std, std_r, rtol=1e-4, atol=1e-4), "std mismatch"
    assert jnp.allclose(action, act_r, rtol=1e-4, atol=1e-4), "action mismatch"

    assert jnp.allclose(mu_g, mu_r, atol=1e-5), "mu mismatch (grid)"
    assert jnp.allclose(ls_g, ls_r, atol=1e-4), "log_std mismatch (grid)"
    assert jnp.allclose(std_g, std_r, rtol=1e-4, atol=1e-4), "std mismatch (grid)"
    assert jnp.allclose(act_g, act_r, rtol=1e-4, atol=1e-4), "action mismatch (grid)"

    print("KERNEL_OK")
</pallas_src>

<mosaic_0001>
module attributes {stable_mosaic.version = 11 : i64} {
  func.func @gaussian_dist_kernel(%arg0: memref<8x32xf32, #tpu.memory_space<vmem>>, %arg1: memref<312x128xf32, #tpu.memory_space<vmem>>, %arg2: memref<8x128xf32, #tpu.memory_space<vmem>>, %arg3: memref<8x128xf32, #tpu.memory_space<vmem>>) attributes {dimension_semantics = [], scalar_prefetch = 0 : i64, scratch_operands = 0 : i64, tpu.core_type = #tpu.core_type<tc>} {
    %c0 = arith.constant 0 : index
    %c0_0 = arith.constant 0 : index
    %0 = vector.load %arg0[%c0, %c0_0] : memref<8x32xf32, #tpu.memory_space<vmem>>, vector<8x32xf32>
    %c0_1 = arith.constant 0 : index
    %c0_2 = arith.constant 0 : index
    %1 = vector.load %arg1[%c0_1, %c0_2] : memref<312x128xf32, #tpu.memory_space<vmem>>, vector<32x128xf32>
    %c32 = arith.constant 32 : index
    %c0_3 = arith.constant 0 : index
    %2 = vector.load %arg1[%c32, %c0_3] : memref<312x128xf32, #tpu.memory_space<vmem>>, vector<1x128xf32>
    %cst = arith.constant dense<0.000000e+00> : vector<8x128xf32>
    %3 = tpu.matmul %0, %1, %cst {dimension_numbers = #tpu.dot_dimension_numbers<[1], [0], [0], [1], [0, 0, 1, 1], [], []>} : vector<8x32xf32>, vector<32x128xf32>, vector<8x128xf32> -> vector<8x128xf32>
    %4 = vector.broadcast %2 : vector<1x128xf32> to vector<8x128xf32>
    %5 = arith.addf %3, %4 : vector<8x128xf32>
    %cst_4 = arith.constant 0.000000e+00 : f32
    %6 = vector.broadcast %cst_4 : f32 to vector<8x128xf32>
    %7 = arith.maximumf %5, %6 : vector<8x128xf32>
    %c40 = arith.constant 40 : index
    %c0_5 = arith.constant 0 : index
    %8 = vector.load %arg1[%c40, %c0_5] : memref<312x128xf32, #tpu.memory_space<vmem>>, vector<128x128xf32>
    %c168 = arith.constant 168 : index
    %c0_6 = arith.constant 0 : index
    %9 = vector.load %arg1[%c168, %c0_6] : memref<312x128xf32, #tpu.memory_space<vmem>>, vector<1x128xf32>
    %cst_7 = arith.constant dense<0.000000e+00> : vector<8x128xf32>
    %10 = tpu.matmul %7, %8, %cst_7 {dimension_numbers = #tpu.dot_dimension_numbers<[1], [0], [0], [1], [0, 0, 1, 1], [], []>} : vector<8x128xf32>, vector<128x128xf32>, vector<8x128xf32> -> vector<8x128xf32>
    %11 = vector.broadcast %9 : vector<1x128xf32> to vector<8x128xf32>
    %12 = arith.addf %10, %11 : vector<8x128xf32>
    %cst_8 = arith.constant 0.000000e+00 : f32
    %13 = vector.broadcast %cst_8 : f32 to vector<8x128xf32>
    %14 = arith.maximumf %12, %13 : vector<8x128xf32>
    %c176 = arith.constant 176 : index
    %c0_9 = arith.constant 0 : index
    %15 = vector.load %arg1[%c176, %c0_9] : memref<312x128xf32, #tpu.memory_space<vmem>>, vector<128x128xf32>
    %c304 = arith.constant 304 : index
    %c0_10 = arith.constant 0 : index
    %16 = vector.load %arg1[%c304, %c0_10] : memref<312x128xf32, #tpu.memory_space<vmem>>, vector<1x128xf32>
    %cst_11 = arith.constant dense<0.000000e+00> : vector<8x128xf32>
    %17 = tpu.matmul %14, %15, %cst_11 {dimension_numbers = #tpu.dot_dimension_numbers<[1], [0], [0], [1], [0, 0, 1, 1], [], []>} : vector<8x128xf32>, vector<128x128xf32>, vector<8x128xf32> -> vector<8x128xf32>
    %18 = vector.broadcast %16 : vector<1x128xf32> to vector<8x128xf32>
    %19 = arith.addf %17, %18 : vector<8x128xf32>
    %20 = math.tanh %19 : vector<8x128xf32>
    %21 = tpu.iota {dimensions = array<i32: 1>} : vector<8x128xi32>
    %c4_i32 = arith.constant 4 : i32
    %22 = vector.broadcast %c4_i32 : i32 to vector<8x128xi32>
    %23 = arith.cmpi sge, %21, %22 : vector<8x128xi32>
    %c12_i32 = arith.constant 12 : i32
    %24 = vector.broadcast %c12_i32 : i32 to vector<8x128xi32>
    %25 = arith.cmpi slt, %21, %24 : vector<8x128xi32>
    %26 = arith.andi %23, %25 : vector<8x128xi1>
    %c16_i32 = arith.constant 16 : i32
    %27 = vector.broadcast %c16_i32 : i32 to vector<8x128xi32>
    %28 = arith.cmpi sge, %21, %27 : vector<8x128xi32>
    %c20_i32 = arith.constant 20 : i32
    %29 = vector.broadcast %c20_i32 : i32 to vector<8x128xi32>
    %30 = arith.cmpi slt, %21, %29 : vector<8x128xi32>
    %31 = arith.andi %28, %30 : vector<8x128xi1>
    %32 = arith.ori %26, %31 : vector<8x128xi1>
    %cst_12 = arith.constant 1.000000e+00 : f32
    %33 = vector.broadcast %cst_12 : f32 to vector<8x128xf32>
    %34 = arith.addf %20, %33 : vector<8x128xf32>
    %cst_13 = arith.constant 1.100000e+01 : f32
    %35 = vector.broadcast %cst_13 : f32 to vector<8x128xf32>
    %36 = arith.mulf %35, %34 : vector<8x128xf32>
    %cst_14 = arith.constant -2.000000e+01 : f32
    %37 = vector.broadcast %cst_14 : f32 to vector<8x128xf32>
    %38 = arith.addf %37, %36 : vector<8x128xf32>
    %39 = arith.select %32, %38, %20 : vector<8x128xi1>, vector<8x128xf32>
    %40 = math.exp %39 : vector<8x128xf32>
    %c4_i32_15 = arith.constant 4 : i32
    %41 = tpu.dynamic_rotate %40 by %c4_i32_15 dim 1 : vector<8x128xf32>, i32 -> vector<8x128xf32>
    %c0_16 = arith.constant 0 : index
    %c0_17 = arith.constant 0 : index
    %42 = vector.load %arg2[%c0_16, %c0_17] : memref<8x128xf32, #tpu.memory_space<vmem>>, vector<8x128xf32>
    %43 = arith.mulf %41, %42 : vector<8x128xf32>
    %44 = arith.addf %39, %43 : vector<8x128xf32>
    %c8_i32 = arith.constant 8 : i32
    %45 = vector.broadcast %c8_i32 : i32 to vector<8x128xi32>
    %46 = arith.cmpi slt, %21, %45 : vector<8x128xi32>
    %c12_i32_18 = arith.constant 12 : i32
    %47 = vector.broadcast %c12_i32_18 : i32 to vector<8x128xi32>
    %48 = arith.cmpi slt, %21, %47 : vector<8x128xi32>
    %c16_i32_19 = arith.constant 16 : i32
    %49 = vector.broadcast %c16_i32_19 : i32 to vector<8x128xi32>
    %50 = arith.cmpi slt, %21, %49 : vector<8x128xi32>
    %cst_20 = arith.constant 0.000000e+00 : f32
    %51 = vector.broadcast %cst_20 : f32 to vector<8x128xf32>
    %52 = arith.select %50, %44, %51 : vector<8x128xi1>, vector<8x128xf32>
    %53 = arith.select %48, %40, %52 : vector<8x128xi1>, vector<8x128xf32>
    %54 = arith.select %46, %39, %53 : vector<8x128xi1>, vector<8x128xf32>
    %c0_21 = arith.constant 0 : index
    %c0_22 = arith.constant 0 : index
    %55 = vector.load %arg3[%c0_21, %c0_22] : memref<8x128xf32, #tpu.memory_space<vmem>>, vector<8x128xf32>
    tpu.vector_store %arg3[%c0_21, %c0_22], %54 {strides = array<i32>} : memref<8x128xf32, #tpu.memory_space<vmem>>, vector<8x128xf32>,
    return
  }
}

</mosaic_0001>

<bundles_post_ra>
// kernel: tpu_custom_call.1
= control target key start
LH: loop header
LB: loop body
LE: loop exit
PB: predicated region body
PF: predicated region fallthrough
CT: control target
= control target key end

     0   :  { %8 = vsyncpa [#allocation3], 0  ;;  %s750_s0 = inlined_call_operand.hbm [shape: f32[8,32], index: 0, kind: input, shape index: {}]   ;;  %s751_s1 = inlined_call_operand.hbm [shape: f32[312,128], index: 1, kind: input, shape index: {}]   ;;  %s752_s2 = inlined_call_operand.hbm [shape: f32[8,128], index: 2, kind: input, shape index: {}]   ;;  %s753_s3 = inlined_call_operand.hbm [shape: f32[8,128], index: 3, kind: output, shape index: {}]  }
   0x1   :  { %9 = vsyncpa [#allocation6], 0 }
   0x2   :  { %10 = vsyncpa [#allocation4], 0  ;;  %s649_s12 = smov [#allocation5]   ;;  %s555_s16 = scalar_lea.hbm %s751_s1, 4992 }
   0x3   :  { %s26_s13 = sshll.u32 %s649_s12, 4  ;;  %p556_p0 = scmp.ne.s32.totalorder %s751_s1, %s555_s16  ;;  %s27_s13 = int_to_ptr.vmem [resolvable:$true] %s26_s13 }
   0x4   :  { %p559_p1 = scmp.lt.u32.totalorder %s555_s16, %s751_s1 }
   0x6   :  { %p561_p2 = pnand %p559_p1, %p556_p0 }
   0x8   :  { %564 = shalt.err (!%p561_p2)
}
   0x9   :  { %s565_s21 = scalar_lea.vmem %s27_s13, 4992  ;;  %p570_p4 = scmp.lt.s32.totalorder %s27_s13, %s27_s13 }
   0xa   :  { %p566_p3 = scmp.ne.s32.totalorder %s27_s13, %s565_s21  ;;  %p571_p5 = scmp.lt.s32.totalorder %s565_s21, %s565_s21 }
   0xc   :  { %p572_p6 = por %p571_p5, %p570_p4 }
   0xe   :  { %p573_p7 = pnand %p572_p6, %p566_p3 }
  0x10   :  { %576 = shalt.err (!%p573_p7)
}
  0x11   :  { %s650_s22 = smov 128   ;;  %s651_s23 = smov 8  }
  0x12   :  { %32 = dma.hbm_to_vmem [thread:$0]  %s751_s1, 4992, %s27_s13, [#allocation6], %s650_s22, %s650_s22, %s651_s23  }
  0x13   :  { %s652_s26 = smov [#allocation2]   ;;  %s653_s28 = smov [#allocation7]  }
  0x14   :  { %s17_s27 = sshll.u32 %s652_s26, 4  ;;  %s39_s29 = sshll.u32 %s653_s28, 4  ;;  %s18_s27 = int_to_ptr.vmem [resolvable:$true] %s17_s27  ;;  %s40_s29 = int_to_ptr.vmem [resolvable:$true] %s39_s29 }
  0x15   :  { %s577_s5 = scalar_lea.hbm %s750_s0, 128 }
  0x16   :  { %p578_p8 = scmp.ne.s32.totalorder %s750_s0, %s577_s5  ;;  %p581_p9 = scmp.lt.u32.totalorder %s577_s5, %s750_s0 }
  0x18   :  { %p583_p10 = pnand %p581_p9, %p578_p8 }
  0x1a   :  { %586 = shalt.err (!%p583_p10)
}
  0x1b   :  { %s587_s1 = scalar_lea.vmem %s18_s27, 128  ;;  %p592_p12 = scmp.lt.s32.totalorder %s18_s27, %s18_s27 }
  0x1c   :  { %p588_p11 = scmp.ne.s32.totalorder %s18_s27, %s587_s1  ;;  %p593_p13 = scmp.lt.s32.totalorder %s587_s1, %s587_s1 }
  0x1e   :  { %p594_p0 = por %p593_p13, %p592_p12 }
  0x20   :  { %p595_p1 = pnand %p594_p0, %p588_p11 }
  0x22   :  { %598 = shalt.err (!%p595_p1)
}
  0x23   :  { %20 = dma.hbm_to_vmem [thread:$0]  %s750_s0, 128, %s18_s27, [#allocation3]  }
  0x24   :  { %s599_s14 = scalar_lea.hbm %s752_s2, 128 }
  0x25   :  { %p600_p2 = scmp.ne.s32.totalorder %s752_s2, %s599_s14  ;;  %p603_p3 = scmp.lt.u32.totalorder %s599_s14, %s752_s2 }
  0x27   :  { %p605_p4 = pnand %p603_p3, %p600_p2 }
  0x29   :  { %608 = shalt.err (!%p605_p4)
}
  0x2a   :  { %s609_s19 = scalar_lea.vmem %s40_s29, 128  ;;  %p614_p6 = scmp.lt.s32.totalorder %s40_s29, %s40_s29 }
  0x2b   :  { %p610_p5 = scmp.ne.s32.totalorder %s40_s29, %s609_s19  ;;  %p615_p7 = scmp.lt.s32.totalorder %s609_s19, %s609_s19 }
  0x2d   :  { %p616_p8 = por %p615_p7, %p614_p6 }
  0x2f   :  { %p617_p9 = pnand %p616_p8, %p610_p5 }
  0x31   :  { %620 = shalt.err (!%p617_p9)
}
  0x32   :  { %42 = dma.hbm_to_vmem [thread:$0]  %s752_s2, 128, %s40_s29, [#allocation6]  }
  0x33   :  { %643 = dma.done.wait [#allocation3], 128  }
  0x34   :  { %644 = vsyncadd [#allocation3], 4294967168 }
  0x35   :  { %645 = dma.done.wait [#allocation6], 5120  }
  0x36   :  { %646 = vsyncadd [#allocation6], 4294962176  ;;  %v654_v0 = vmov 0.0|0.0   ;;  %vm655_vm0 = vmmov 0   ;;  %v656_v1 = vmov 0.0   ;;  %v53_v2 = vld [vmem:[#allocation5] sm:$0xff] }
  0x37   :  { %487 = vmatprep.subr.bf16.mxu0 %v654_v0  ;;  %414 = vmatprep.mubr.msk.f32.mxu0 %vm655_vm0, %v656_v1  ;;  %v54_v3 = vld [vmem:[#allocation5 + $0x8] sm:$0xff]  ;;  %v55_v4 = vld [vmem:[#allocation5 + $0x10] sm:$0xff]  ;;  %v56_v6 = vld [vmem:[#allocation5 + $0x18] sm:$0xff]  ;;  %vm62_vm1 = vcmask 261120   ;;  %s657_s2 = smov 4   ;;  %s658_s21 = smov [#allocation8]  }
  0x38   :  { %493 = vmatprep.subr.bf16.mxu1 %v654_v0  ;;  %449 = vmatprep.mubr.msk.f32.mxu1 %vm655_vm0, %v656_v1  ;;  %v488_v5 = vpack.c.bf16 %v54_v3, %v53_v2  ;;  %v137_v7 = vld [vmem:[#allocation5 + $0x28] sm:$0xff]  ;;  %v138_v8 = vld [vmem:[#allocation5 + $0x30] sm:$0xff]  ;;  %v139_v9 = vld [vmem:[#allocation5 + $0x38] sm:$0xff]  ;;  %v491_v11 = vpack.c.bf16 %v56_v6, %v55_v4  ;;  %s353_s22 = sshll.u32 %s658_s21, 4  ;;  %s354_s22 = int_to_ptr.vmem [resolvable:$true] %s353_s22 }
  0x39   :  { %v140_v10 = vld [vmem:[#allocation5 + $0x40] sm:$0xff]  ;;  %v494_v12 = vpack.c.bf16 %v138_v8, %v137_v7  ;;  %v141_v14 = vld [vmem:[#allocation5 + $0x48] sm:$0xff]  ;;  %v142_v15 = vld [vmem:[#allocation5 + $0x50] sm:$0xff]  ;;  %v321_v7 = vlaneseq  ;;  %s621_s23 = scalar_lea.vmem %s354_s22, 128  ;;  %p626_p11 = scmp.lt.s32.totalorder %s354_s22, %s354_s22 }
  0x3a   :  { %489 = vmatpush3.bf16.msra.mxu0 %v488_v5  ;;  %v497_v13 = vpack.c.bf16 %v140_v10, %v139_v9  ;;  %v52_v16 = vld [vmem:[#allocation2] sm:$0xff]  ;;  %v500_v17 = vpack.c.bf16 %v142_v15, %v141_v14  ;;  %v144_v19 = vld [vmem:[#allocation5 + $0x60] sm:$0xff]  ;;  %v145_v21 = vld [vmem:[#allocation5 + $0x68] sm:$0xff]  ;;  %p622_p10 = scmp.ne.s32.totalorder %s354_s22, %s621_s23  ;;  %p627_p12 = scmp.lt.s32.totalorder %s621_s23, %s621_s23 }
  0x3b   :  { %490 = vmatprep.subr.bf16.mxu0 %v654_v0  ;;  %495 = vmatpush3.bf16.msra.mxu1 %v494_v12  ;;  %v143_v18 = vld [vmem:[#allocation5 + $0x58] sm:$0xff]  ;;  %v146_v22 = vld [vmem:[#allocation5 + $0x70] sm:$0xff]  ;;  %v148_v25 = vld [vmem:[#allocation5 + $0x80] sm:$0xff]  ;;  %v322_v8 = vand.u32 127, %v321_v7 }
  0x3c   :  { %496 = vmatprep.subr.bf16.mxu1 %v654_v0  ;;  %v503_v20 = vpack.c.bf16 %v144_v19, %v143_v18  ;;  %v506_v23 = vpack.c.bf16 %v146_v22, %v145_v21  ;;  %v147_v24 = vld [vmem:[#allocation5 + $0x78] sm:$0xff]  ;;  %v149_v27 = vld [vmem:[#allocation5 + $0x88] sm:$0xff]  ;;  %v150_v28 = vld [vmem:[#allocation5 + $0x90] sm:$0xff]  ;;  %p628_p13 = por %p627_p12, %p626_p11 }
  0x3d   :  { %v509_v26 = vpack.c.bf16 %v148_v25, %v147_v24  ;;  %v512_v29 = vpack.c.bf16 %v150_v28, %v149_v27  ;;  %v151_v30 = vld [vmem:[#allocation5 + $0x98] sm:$0xff]  ;;  %v152_v31 = vld [vmem:[#allocation5 + $0xa0] sm:$0xff]  ;;  %v229_v33 = vld [vmem:[#allocation5 + $0xb0] sm:$0xff]  ;;  %vm323_vm2 = vcmp.ge.s32.totalorder %v322_v8, 4  ;;  %vm324_vm3 = vcmp.lt.s32.totalorder %v322_v8, 12 }
  0x3e   :  { %492 = vmatpush3.bf16.msra.mxu0 %v491_v11  ;;  %v515_v32 = vpack.c.bf16 %v152_v31, %v151_v30  ;;  %v230_v34 = vld [vmem:[#allocation5 + $0xb8] sm:$0xff]  ;;  %v231_v35 = vld [vmem:[#allocation5 + $0xc0] sm:$0xff]  ;;  %v232_v37 = vld [vmem:[#allocation5 + $0xc8] sm:$0xff]  ;;  %vm326_vm4 = vcmp.ge.s32.totalorder %v322_v8, 16  ;;  %vm327_vm5 = vcmp.lt.s32.totalorder %v322_v8, 20  ;;  %vm342_vm9 = vcmp.lt.s32.totalorder %v322_v8, 16  ;;  %p629_p0 = pnand %p628_p13, %p622_p10 }
  0x3f   :  { %517 = vmatprep.subr.bf16.mxu0 %v654_v0  ;;  %498 = vmatpush3.bf16.msra.mxu1 %v497_v13  ;;  %v518_v36 = vpack.c.bf16 %v230_v34, %v229_v33  ;;  %v521_v38 = vpack.c.bf16 %v232_v37, %v231_v35  ;;  %v233_v39 = vld [vmem:[#allocation5 + $0xd0] sm:$0xff]  ;;  %v234_v40 = vld [vmem:[#allocation5 + $0xd8] sm:$0xff]  ;;  %v235_v42 = vld [vmem:[#allocation5 + $0xe0] sm:$0xff]  ;;  %vm341_vm10 = vcmp.lt.s32.totalorder %v322_v8, 8 }
  0x40   :  { %499 = vmatprep.subr.bf16.mxu1 %v654_v0  ;;  %v524_v41 = vpack.c.bf16 %v234_v40, %v233_v39  ;;  %v236_v43 = vld [vmem:[#allocation5 + $0xe8] sm:$0xff]  ;;  %v237_v45 = vld [vmem:[#allocation5 + $0xf0] sm:$0xff]  ;;  %v238_v46 = vld [vmem:[#allocation5 + $0xf8] sm:$0xff] }
  0x41   :  { %415 = vmatmul.mubr.msk.f32.vlgmr.msra.gmra.mrb[0].mxu0 %vm62_vm1, %v52_v16  ;;  %v527_v44 = vpack.c.bf16 %v236_v43, %v235_v42  ;;  %v530_v47 = vpack.c.bf16 %v238_v46, %v237_v45  ;;  %v239_v48 = vld [vmem:[#allocation5 + $0x100] sm:$0xff]  ;;  %v240_v49 = vld [vmem:[#allocation5 + $0x108] sm:$0xff]  ;;  %v241_v51 = vld [vmem:[#allocation5 + $0x110] sm:$0xff] }
  0x42   :  { %484 = vmatprep.mubr.msk.f32.mxu0 %vm655_vm0, %v656_v1  ;;  %519 = vmatpush3.bf16.msra.mxu0 %v518_v36  ;;  %v533_v50 = vpack.c.bf16 %v240_v49, %v239_v48  ;;  %v242_v52 = vld [vmem:[#allocation5 + $0x118] sm:$0xff]  ;;  %v363_v54 = vld [vmem:[#allocation5 + $0x20] ss:$0 sm:$0xff]  ;;  %v244_v60 = vld [vmem:[#allocation5 + $0x128] sm:$0xff] }
  0x43   :  { %501 = vmatpush3.bf16.msra.mxu1 %v500_v17  ;;  %520 = vmatprep.subr.bf16.mxu0 %v654_v0  ;;  %v536_v53 = vpack.c.bf16 %v242_v52, %v241_v51  ;;  %v243_v59 = vld [vmem:[#allocation5 + $0x120] sm:$0xff]  ;;  %v365_v62 = vld [vmem:[#allocation5 + $0xa8] ss:$0 sm:$0xff]  ;;  %v366_v4 = vld [vmem:[#allocation5 + $0x130] ss:$0 sm:$0xff] }
  0x44   :  { %502 = vmatprep.subr.bf16.mxu1 %v654_v0  ;;  %v539_v61 = vpack.c.bf16 %v244_v60, %v243_v59  ;;  %vm325_vm6 = vmand %vm323_vm2, %vm324_vm3  ;;  %v338_v16 = vld [vmem:[#allocation7] sm:$0xff] }
  0x45   :  { %vm328_vm7 = vmand %vm326_vm4, %vm327_vm5 }
  0x46   :  { %522 = vmatpush3.bf16.msra.mxu0 %v521_v38  ;;  %vm329_vm8 = vmor %vm325_vm6, %vm328_vm7 }
  0x47   :  { %504 = vmatpush3.bf16.msra.mxu1 %v503_v20  ;;  %523 = vmatprep.subr.bf16.mxu0 %v654_v0 }
  0x48   :  { %505 = vmatprep.subr.bf16.mxu1 %v654_v0 }
  0x4a   :  { %525 = vmatpush3.bf16.msra.mxu0 %v524_v41 }
  0x4b   :  { %507 = vmatpush3.bf16.msra.mxu1 %v506_v23  ;;  %526 = vmatprep.subr.bf16.mxu0 %v654_v0 }
  0x4c   :  { %508 = vmatprep.subr.bf16.mxu1 %v654_v0 }
  0x4e   :  { %528 = vmatpush3.bf16.msra.mxu0 %v527_v44 }
  0x4f   :  { %510 = vmatpush3.bf16.msra.mxu1 %v509_v26  ;;  %529 = vmatprep.subr.bf16.mxu0 %v654_v0 }
  0x50   :  { %511 = vmatprep.subr.bf16.mxu1 %v654_v0 }
  0x52   :  { %531 = vmatpush3.bf16.msra.mxu0 %v530_v47 }
  0x53   :  { %513 = vmatpush3.bf16.msra.mxu1 %v512_v29  ;;  %532 = vmatprep.subr.bf16.mxu0 %v654_v0 }
  0x54   :  { %514 = vmatprep.subr.bf16.mxu1 %v654_v0 }
  0x56   :  { %534 = vmatpush3.bf16.msra.mxu0 %v533_v50 }
  0x57   :  { %516 = vmatpush3.bf16.msra.mxu1 %v515_v32  ;;  %535 = vmatprep.subr.bf16.mxu0 %v654_v0 }
  0x5a   :  { %537 = vmatpush3.bf16.msra.mxu0 %v536_v53 }
  0x5b   :  { %538 = vmatprep.subr.bf16.mxu0 %v654_v0 }
  0x5e   :  { %540 = vmatpush3.bf16.msra.mxu0 %v539_v61 }
 0x114   :  { %v132_v55 = vpop.f32.mrb[0].mxu0 }
 0x115   :  { %v133_v56 = vadd.f32 %v363_v54, %v132_v55  ;;  %v416_v57 = vpop.f32.mrb[1].mxu0 }
 0x117   :  { %v136_v58 = vmax.f32 %v133_v56, 0.0 }
 0x119   :  { %450 = vmatmul.mubr.f32.vlgmr.msra.gmra.mrb[0].mxu1 %v136_v58 }
 0x1ec   :  { %v224_v63 = vpop.f32.mrb[0].mxu1 }
 0x1ed   :  { %v225_v1 = vadd.f32 %v365_v62, %v224_v63  ;;  %v451_v2 = vpop.f32.mrb[1].mxu1 }
 0x1ef   :  { %v228_v3 = vmax.f32 %v225_v1, 0.0 }
 0x1f1   :  { %485 = vmatmul.mubr.f32.vlgmr.msra.gmra.mrb[2].mxu0 %v228_v3 }
 0x2c4   :  { %v316_v5 = vpop.f32.mrb[2].mxu0 }
 0x2c5   :  { %v317_v6 = vadd.f32 %v366_v4, %v316_v5  ;;  %v486_v0 = vpop.f32.mrb[3].mxu0 }
 0x2c7   :  { %551 = vtanh.f32 %v317_v6 }
 0x2d1   :  { %v552_v9 = vpop.eup %551 }
 0x2d2   :  { %v330_v10 = vadd.f32 1.0, %v552_v9 }
 0x2d4   :  { %v331_v11 = vmul.f32 11.0, %v330_v10 }
 0x2d6   :  { %v332_v12 = vadd.f32 -20.0, %v331_v11 }
 0x2d8   :  { %v333_v13 = vsel %vm329_vm8, %v332_v12, %v552_v9 }
 0x2d9   :  { %v334_v14 = vmul.f32 1.442695, %v333_v13 }
 0x2db   :  { %553 = vpow2.f32 %v334_v14 }
 0x2e5   :  { %v554_v15 = vpop.eup %553 }
 0x2e6   :  { %336 = vrot.lane.b32.xlu0 %v554_v15, %s657_s2 }
 0x358   :  { %v337_v17 = vpop.permute.xlu0 %336 }
 0x359   :  { %v339_v18 = vmul.f32 %v338_v16, %v337_v17 }
 0x35b   :  { %v340_v19 = vadd.f32 %v339_v18, %v333_v13 }
 0x35d   :  { %v343_v20 = vsel %vm342_vm9, %v340_v19, 0.0 }
 0x35e   :  { %v344_v21 = vsel %vm324_vm3, %v554_v15, %v343_v20 }
 0x35f   :  { %v345_v22 = vsel %vm341_vm10, %v333_v13, %v344_v21 }
 0x360   :  { %346 = vst [vmem:[#allocation8] sm:$0xff] %v345_v22 }
 0x361   :  { %632 = shalt.err (!%p629_p0)
}
 0x362   :  { %s633_s26 = scalar_lea.hbm %s753_s3, 128 }
 0x363   :  { %p634_p1 = scmp.ne.s32.totalorder %s753_s3, %s633_s26  ;;  %p637_p2 = scmp.lt.u32.totalorder %s633_s26, %s753_s3 }
 0x365   :  { %p639_p3 = pnand %p637_p2, %p634_p1 }
 0x367   :  { %642 = shalt.err (!%p639_p3)
}
 0x368   :  { %356 = dma.vmem_to_hbm [thread:$0]  %s354_s22, 128, %s753_s3, [#allocation4]  }
 0x369   :  { %647 = dma.done.wait [#allocation4], 128  }
 0x36a   :  { %648 = vsyncadd [#allocation4], 4294967168 }
 0x36b   :  { %360 = vsyncpa [#allocation3], 1 }
 0x36c   :  { %361 = vsyncpa [#allocation6], 1 }
 0x36d   :  { %362 = vsyncpa [#allocation4], 1 }

</bundles_post_ra>
